<compile_context>
chip_gen: v7x
topology: tpu7x:2x2x1
jax: 0.10.0
libtpu: 0.0.40
codegen_flags: <defaults>
</compile_context>

<pallas_src>
import jax
import jax.numpy as jnp
from jax.experimental import pallas as pl
from jax.experimental.pallas import tpu as pltpu


def _weighted_kernel(g_ref, b_ref, a_ref, wg_ref, wa_ref):
    # All refs are 2-D (tR, C) tiles: lane-dense last dim, no broadcasts
    # (batch dim is squeezed by the BlockSpec; b/a slabs are batch-invariant).
    wg = g_ref[...] * b_ref[...]
    wg_ref[...] = wg
    wa_ref[...] = a_ref[...] * wg


def _sublane_multiple(dtype):
    # Rows per packed vreg: 8 (f32), 16 (bf16/f16), 32 (int8/fp8).
    itemsize = jnp.dtype(dtype).itemsize
    return max(8, 32 // max(itemsize, 1))


def _vmem_budget_bytes():
    # Generation-aware scoped-VMEM limit: ~75% of physical, capped at 64 MiB.
    #   v7x (64 MiB physical)  -> 48 MiB scoped
    #   v5e/v6e (128 MiB)      -> 64 MiB scoped
    try:
        cap = pltpu.get_tpu_info().vmem_capacity_bytes
    except Exception:
        cap = 64 * 1024 * 1024  # conservative (v7x-sized) fallback
    return min((cap * 3) // 4, 64 * 1024 * 1024)


def _choose_layout(n, sublane_mult):
    """Pick a lane-dense 2-D view (R, C) of a flat length-n slab (n % 128 == 0)."""
    c = 128
    for cand in (2048, 1024, 512, 256):
        if n % cand == 0 and (n // cand) >= sublane_mult:
            c = cand
            break
    return n // c, c


def _choose_row_tile(R, target_rows, sublane_mult):
    """Row tile: sublane-multiple, ~target_rows, prefer a divisor of R."""
    if R <= target_rows:
        return R  # full dim -> always a legal, unmasked block
    tR = max(sublane_mult, (target_rows // sublane_mult) * sublane_mult)
    # Prefer a tile that divides R exactly (kills the masked tail block), but
    # never shrink below half the target (keeps per-step DMAs big).
    t = tR
    floor = max(sublane_mult, tR // 2)
    while t >= floor:
        if R % t == 0:
            return t
        t -= sublane_mult
    return tR


def module_4_forward(gru_out, b_embedding, a_embedding, dropout=0.0,
                     force_pallas=None):
    """Pallas implementation of Module_4.forward (dropout in eval mode)."""
    B, S, H = gru_out.shape
    Nb, Mb, Hb = b_embedding.shape
    Na, Ma, Ha = a_embedding.shape
    assert Nb * Mb == S and Na * Ma == S
    assert Hb == H and Ha == H

    # Follow torch type promotion for the products (single common dtype; the
    # three inputs share a dtype in practice).
    out_dtype = jnp.result_type(gru_out.dtype, b_embedding.dtype,
                                a_embedding.dtype)
    itemsize = jnp.dtype(out_dtype).itemsize
    N = S * H

    # Tiny-shape bypass: pallas_call fixed cost dominates; let XLA fuse it.
    use_pallas = (B * N >= (1 << 16)) if force_pallas is None else force_pallas
    if not use_pallas:
        b_exp = jnp.broadcast_to(b_embedding.reshape(1, S, H),
                                 (B, S, H)).astype(out_dtype)
        a_exp = jnp.broadcast_to(a_embedding.reshape(1, S, H),
                                 (B, S, H)).astype(out_dtype)
        wg = gru_out.astype(out_dtype) * b_exp
        wa = a_exp * wg
        return wg, wa, gru_out, b_embedding, a_embedding

    sub = _sublane_multiple(out_dtype)

    # Flatten the per-batch slab; if it is not 128-divisible, zero-pad it once
    # so the hot path is always lane-dense (unmasked stores).  Zeros are
    # multiplicatively inert and get sliced off afterwards.
    g_flat = gru_out.reshape(B, N).astype(out_dtype)
    b_flat = b_embedding.reshape(N).astype(out_dtype)
    a_flat = a_embedding.reshape(N).astype(out_dtype)

    quantum = 128 * sub
    N_pad = N if N % 128 == 0 else ((N + quantum - 1) // quantum) * quantum
    if N_pad != N:
        pad = N_pad - N
        g_flat = jnp.pad(g_flat, ((0, 0), (0, pad)))
        b_flat = jnp.pad(b_flat, (0, pad))
        a_flat = jnp.pad(a_flat, (0, pad))

    R, C = _choose_layout(N_pad, sub)
    g2 = g_flat.reshape(B, R, C)
    b2 = b_flat.reshape(R, C)
    a2 = a_flat.reshape(R, C)

    # Row tiling: ~4 MiB per buffer per grid step (5 arrays x 2 pipeline
    # buffers <= scoped VMEM limit), amortizing per-step pipeline overhead.
    vmem_limit = _vmem_budget_bytes()
    tile_bytes = max(1 << 20, min(4 << 20, vmem_limit // 12))
    target_rows = max(sub, tile_bytes // (C * itemsize))
    tR = _choose_row_tile(R, target_rows, sub)
    grid_r = pl.cdiv(R, tR)

    # Grid = (row_tiles, batch); batch inner and "arbitrary" so the
    # batch-invariant b/a blocks keep the same index across the inner loop
    # (fetched once per row tile) and row tiles shard across TensorCores.
    grid = (grid_r, B)

    cost = pl.CostEstimate(
        flops=2 * B * S * H,
        transcendentals=0,
        bytes_accessed=(3 * B + 2) * S * H * itemsize,
    )

    wg, wa = pl.pallas_call(
        _weighted_kernel,
        out_shape=(
            jax.ShapeDtypeStruct((B, R, C), out_dtype),
            jax.ShapeDtypeStruct((B, R, C), out_dtype),
        ),
        grid_spec=pltpu.PrefetchScalarGridSpec(
            num_scalar_prefetch=0,
            grid=grid,
            in_specs=[
                # Batch dim squeezed (None) -> 2-D kernel refs.
                pl.BlockSpec((None, tR, C), lambda r, b: (b, r, 0)),  # gru_out
                pl.BlockSpec((tR, C), lambda r, b: (r, 0)),           # b slab
                pl.BlockSpec((tR, C), lambda r, b: (r, 0)),           # a slab
            ],
            out_specs=[
                pl.BlockSpec((None, tR, C), lambda r, b: (b, r, 0)),
                pl.BlockSpec((None, tR, C), lambda r, b: (b, r, 0)),
            ],
        ),
        compiler_params=pltpu.CompilerParams(
            dimension_semantics=("parallel", "arbitrary"),
            vmem_limit_bytes=vmem_limit,
        ),
        cost_estimate=cost,
    )(g2, b2, a2)

    if N_pad != N:
        wg = wg.reshape(B, N_pad)[:, :N]
        wa = wa.reshape(B, N_pad)[:, :N]
    wg = wg.reshape(B, S, H)
    wa = wa.reshape(B, S, H)

    # nn.Dropout with p=0 / eval mode is an identity.
    # TODO(synk): training-mode dropout (pltpu.prng_seed + prng_random_bits
    #             mask with 1/(1-p) rescale) not implemented.
    return wg, wa, gru_out, b_embedding, a_embedding


def _reference(gru_out, b_embedding, a_embedding):
    B, S, H = gru_out.shape
    b_exp = jnp.broadcast_to(b_embedding.reshape(1, S, H), (B, S, H))
    a_exp = jnp.broadcast_to(a_embedding.reshape(1, S, H), (B, S, H))
    wg = gru_out * b_exp
    wa = a_exp * wg
    return wg, wa


if __name__ == "__main__":
    key = jax.random.PRNGKey(0)

    # --- Test 1: small module-sized shapes, Pallas path forced (128-divisible)
    k1, k2, k3, key = jax.random.split(key, 4)
    B, H = 2, 32
    Nb, Mb = 2, 4          # S = 8
    Na, Ma = 4, 2          # S = 8
    S = Nb * Mb
    gru_out = jax.random.normal(k1, (B, S, H), dtype=jnp.float32)
    b_embedding = jax.random.normal(k2, (Nb, Mb, H), dtype=jnp.float32)
    a_embedding = jax.random.normal(k3, (Na, Ma, H), dtype=jnp.float32)

    wg, wa, g_out, b_out, a_out = module_4_forward(
        gru_out, b_embedding, a_embedding, dropout=0.0, force_pallas=True)
    jax.block_until_ready((wg, wa, g_out, b_out, a_out))
    wg_ref, wa_ref = _reference(gru_out, b_embedding, a_embedding)
    assert wg.shape == (B, S, H) and wa.shape == (B, S, H)
    assert jnp.allclose(wg, wg_ref, atol=1e-6)
    assert jnp.allclose(wa, wa_ref, atol=1e-6)

    # --- Test 2: non-128-divisible slab -> padded lane-dense path
    k1, k2, k3, key = jax.random.split(key, 4)
    B, H = 2, 20
    Nb, Mb = 2, 3          # S = 6
    Na, Ma = 3, 2          # S = 6
    S = Nb * Mb
    gru_out = jax.random.normal(k1, (B, S, H), dtype=jnp.float32)
    b_embedding = jax.random.normal(k2, (Nb, Mb, H), dtype=jnp.float32)
    a_embedding = jax.random.normal(k3, (Na, Ma, H), dtype=jnp.float32)

    wg, wa, _, _, _ = module_4_forward(
        gru_out, b_embedding, a_embedding, dropout=0.0, force_pallas=True)
    jax.block_until_ready((wg, wa))
    wg_ref, wa_ref = _reference(gru_out, b_embedding, a_embedding)
    assert wg.shape == (B, S, H) and wa.shape == (B, S, H)
    assert jnp.allclose(wg, wg_ref, atol=1e-6)
    assert jnp.allclose(wa, wa_ref, atol=1e-6)

    # --- Test 3: moderately larger shape through the automatic (tiled) path
    k1, k2, k3, key = jax.random.split(key, 4)
    B, H = 2, 128
    Nb, Mb = 16, 32        # S = 512
    Na, Ma = 32, 16        # S = 512
    S = Nb * Mb
    gru_out = jax.random.normal(k1, (B, S, H), dtype=jnp.float32)
    b_embedding = jax.random.normal(k2, (Nb, Mb, H), dtype=jnp.float32)
    a_embedding = jax.random.normal(k3, (Na, Ma, H), dtype=jnp.float32)

    wg, wa, _, _, _ = module_4_forward(
        gru_out, b_embedding, a_embedding, dropout=0.0)
    jax.block_until_ready((wg, wa))
    wg_ref, wa_ref = _reference(gru_out, b_embedding, a_embedding)
    assert jnp.allclose(wg, wg_ref, atol=1e-6)
    assert jnp.allclose(wa, wa_ref, atol=1e-6)

    print("KERNEL_OK")
</pallas_src>

<mosaic_0001>
module attributes {stable_mosaic.version = 11 : i64} {
  func.func @_weighted_kernel(%arg0: i32, %arg1: i32, %arg2: memref<1x2x128xf32, #tpu.memory_space<vmem>>, %arg3: memref<2x128xf32, #tpu.memory_space<vmem>>, %arg4: memref<2x128xf32, #tpu.memory_space<vmem>>, %arg5: memref<1x2x128xf32, #tpu.memory_space<vmem>>, %arg6: memref<1x2x128xf32, #tpu.memory_space<vmem>>) attributes {dimension_semantics = [#tpu.dimension_semantics<parallel>, #tpu.dimension_semantics<arbitrary>], iteration_bounds = array<i64: 1, 2>, scalar_prefetch = 0 : i64, scratch_operands = 0 : i64, tpu.core_type = #tpu.core_type<tc>, window_params = [{transform_indices = @transform_0, window_bounds = array<i64: 1, 2, 128>}, {transform_indices = @transform_1, window_bounds = array<i64: 2, 128>}, {transform_indices = @transform_2, window_bounds = array<i64: 2, 128>}, {transform_indices = @transform_3, window_bounds = array<i64: 1, 2, 128>}, {transform_indices = @transform_4, window_bounds = array<i64: 1, 2, 128>}]} {
    %c0 = arith.constant 0 : index
    %c0_0 = arith.constant 0 : index
    %c0_1 = arith.constant 0 : index
    %0 = vector.load %arg2[%c0, %c0_0, %c0_1] : memref<1x2x128xf32, #tpu.memory_space<vmem>>, vector<1x2x128xf32>
    %1 = vector.shape_cast %0 : vector<1x2x128xf32> to vector<2x128xf32>
    %c0_2 = arith.constant 0 : index
    %c0_3 = arith.constant 0 : index
    %2 = vector.load %arg3[%c0_2, %c0_3] : memref<2x128xf32, #tpu.memory_space<vmem>>, vector<2x128xf32>
    %3 = arith.mulf %1, %2 : vector<2x128xf32>
    %c0_4 = arith.constant 0 : index
    %c0_5 = arith.constant 0 : index
    %c0_6 = arith.constant 0 : index
    %4 = vector.load %arg5[%c0_4, %c0_5, %c0_6] : memref<1x2x128xf32, #tpu.memory_space<vmem>>, vector<1x2x128xf32>
    %5 = vector.shape_cast %4 : vector<1x2x128xf32> to vector<2x128xf32>
    %6 = vector.shape_cast %3 : vector<2x128xf32> to vector<1x2x128xf32>
    tpu.vector_store %arg5[%c0_4, %c0_5, %c0_6], %6 {strides = array<i32>} : memref<1x2x128xf32, #tpu.memory_space<vmem>>, vector<1x2x128xf32>,
    %c0_7 = arith.constant 0 : index
    %c0_8 = arith.constant 0 : index
    %7 = vector.load %arg4[%c0_7, %c0_8] : memref<2x128xf32, #tpu.memory_space<vmem>>, vector<2x128xf32>
    %8 = arith.mulf %7, %3 : vector<2x128xf32>
    %c0_9 = arith.constant 0 : index
    %c0_10 = arith.constant 0 : index
    %c0_11 = arith.constant 0 : index
    %9 = vector.load %arg6[%c0_9, %c0_10, %c0_11] : memref<1x2x128xf32, #tpu.memory_space<vmem>>, vector<1x2x128xf32>
    %10 = vector.shape_cast %9 : vector<1x2x128xf32> to vector<2x128xf32>
    %11 = vector.shape_cast %8 : vector<2x128xf32> to vector<1x2x128xf32>
    tpu.vector_store %arg6[%c0_9, %c0_10, %c0_11], %11 {strides = array<i32>} : memref<1x2x128xf32, #tpu.memory_space<vmem>>, vector<1x2x128xf32>,
    return
  }
  func.func @transform_0(%arg0: i32, %arg1: i32) -> (i32, i32, i32) {
    %c0_i32 = arith.constant 0 : i32
    %c0_i32_0 = arith.constant 0 : i32
    return %arg1, %arg0, %c0_i32 : i32, i32, i32
  }
  func.func @transform_1(%arg0: i32, %arg1: i32) -> (i32, i32) {
    %c0_i32 = arith.constant 0 : i32
    %c0_i32_0 = arith.constant 0 : i32
    return %arg0, %c0_i32 : i32, i32
  }
  func.func @transform_2(%arg0: i32, %arg1: i32) -> (i32, i32) {
    %c0_i32 = arith.constant 0 : i32
    %c0_i32_0 = arith.constant 0 : i32
    return %arg0, %c0_i32 : i32, i32
  }
  func.func @transform_3(%arg0: i32, %arg1: i32) -> (i32, i32, i32) {
    %c0_i32 = arith.constant 0 : i32
    %c0_i32_0 = arith.constant 0 : i32
    return %arg1, %arg0, %c0_i32 : i32, i32, i32
  }
  func.func @transform_4(%arg0: i32, %arg1: i32) -> (i32, i32, i32) {
    %c0_i32 = arith.constant 0 : i32
    %c0_i32_0 = arith.constant 0 : i32
    return %arg1, %arg0, %c0_i32 : i32, i32, i32
  }
}

</mosaic_0001>

<bundles_post_ra>
// kernel: tpu_custom_call.1
= control target key start
LH: loop header
LB: loop body
LE: loop exit
PB: predicated region body
PF: predicated region fallthrough
CT: control target
= control target key end

     0   :  { %10 = vsyncpa [#allocation3], 0  ;;  %s936_s0 = inlined_call_operand.hbm [shape: f32[2,2,128], index: 0, kind: input, shape index: {}]   ;;  %s937_s1 = inlined_call_operand.vmem [shape: f32[2,128], index: 1, kind: input, shape index: {}]   ;;  %s938_s2 = inlined_call_operand.vmem [shape: f32[2,128], index: 2, kind: input, shape index: {}]   ;;  %s939_s3 = inlined_call_operand.hbm [shape: f32[2,2,128], index: 3, kind: output, shape index: {0}]   ;;  %s940_s4 = inlined_call_operand.hbm [shape: f32[2,2,128], index: 4, kind: output, shape index: {1}]  }
   0x1   :  { %12 = vsyncpa [#allocation3 + $0x1], 0 }
   0x2   :  { %13 = vsyncpa [#allocation4], 0 }
   0x3   :  { %15 = vsyncpa [#allocation4 + $0x1], 0 }
   0x4   :  { %16 = vsyncpa [#allocation7], 0 }
   0x5   :  { %18 = vsyncpa [#allocation7 + $0x1], 0  ;;  %s720_s15 = smov 0   ;;  %s722_s16 = smov 0  }
   0x6   :  { %s724_s17 = smov 0   ;;  %s726_s18 = smov 0  }
   0x7   :  { %s728_s19 = smov 0   ;;  %s730_s20 = smov 0  }
   0x8 LB: > { %s461_s21 = sadd.s32 4294967295, %s690_s20   ;;  %s462_s22 = sadd.s32 4294967294, %s690_s20   ;;  %s690_s20 = sphi %s730_s20, %s24_s20   ;;  %s686_s19 = sphi %s728_s19, %s956_s19   ;;  %s682_s18 = sphi %s726_s18, %s955_s18   ;;  %s678_s17 = sphi %s724_s17, %s954_s17   ;;  %s674_s16 = sphi %s722_s16, %s953_s16   ;;  %s670_s15 = sphi %s720_s15, %s952_s15  }
   0x9   : > { %s33_s23 = sadd.s32 1, %s686_s19  ;;  %s45_s24 = sadd.s32 1, %s678_s17 }
   0xa   : > { %p34_p0 = scmp.ge.s32.totalorder %s33_s23, 2  ;;  %p52_p1 = scmp.ne.s32.totalorder %s678_s17, %s674_s16 }
   0xb   : > { %p53_p2 = scmp.eq.s32.totalorder %s690_s20, 0  ;;  %p58_p3 = scmp.ne.s32.totalorder %s674_s16, %s670_s15 }
   0xc   : > { %s958_s23 = smov (%p34_p0, %s33_s23), 0  ;;  %p59_p5 = scmp.eq.s32.totalorder %s461_s21, 0 }
   0xd   : > { %p761_p4 = por %p53_p2, %p52_p1  ;;  %s40_s26 = ssub.s32 %s686_s19, %s958_s23 }
   0xe   : > { %p136_p6 = scmp.eq.s32.totalorder %s461_s21, 1  ;;  %p43_p7 = scmp.eq.s32.totalorder %s40_s26, 0 }
   0xf   : > { %p767_p8 = por %p59_p5, %p58_p3  ;;  %p142_p10 = scmp.eq.s32.totalorder %s462_s22, 1 }
  0x10   : > { %p771_p9 = por %p136_p6, %p52_p1  ;;  %p496_p13 = scmp.lt.s32.totalorder %s690_s20, 2 }
  0x11   : > { %s776_s29 = scalar_select %p43_p7, %s678_s17, %s45_s24  }
  0x12   : > { %s944_s28 = scalar_select %p771_p9, 1, 0 }
  0x13   : > { %p778_p11 = por %p142_p10, %p58_p3  ;;  %s204_s5 = sand.u32 1, %s678_s17  }
  0x14   : > { %s467_s6 = sshll.u32 %s204_s5, 1  ;;  %s468_s7 = sshll.u32 %s686_s19, 5 }
  0x15   : > { %s945_s30 = scalar_select %p778_p11, 1, 0 }
  0x16   : > { %s789_s10 = scalar_lea.hbm %s936_s0, %s468_s7  ;;  %s208_s11 = scalar_lea.vmem [#allocation2], %s467_s6 }
  0x17   : > { %s216_s12 = sshll.u32 %s208_s11, 4  ;;  %p795_p0 = pnand %p496_p13, %p761_p4  ;;  %s791_s12 = int_to_ptr.vmem [resolvable:$true] %s216_s12 }
  0x18   : > { %s205_s14 = scalar_lea.sflag [#allocation3], %s204_s5  ;;  %s546_s21 = scalar_lea.hbm %s789_s10, 32 }
  0x19   : > { %p547_p3 = scmp.ne.s32.totalorder %s789_s10, %s546_s21  ;;  %p548_p5 = pneg %p795_p0 }
  0x1a   : > { %s551_s25 = scalar_lea.hbm %s936_s0, 64  ;;  %p552_p4 = scmp.lt.u32.totalorder %s789_s10, %s936_s0 }
  0x1b   : > { %p549_p6 = pnand %p548_p5, %p547_p3  ;;  %p553_p10 = scmp.lt.u32.totalorder %s551_s25, %s546_s21 }
  0x1c   : > { %p555_p12 = scmp.lt.u32.totalorder %s546_s21, %s789_s10 }
  0x1d   : > { %p550_p7 = pneg %p549_p6  ;;  %p554_p13 = por %p553_p10, %p552_p4 }
  0x1f   : > { %p556_p1 = por %p555_p12, %p554_p13 }
  0x21   : > { %p557_p2 = pnand %p556_p1, %p550_p7 }
  0x23   : > { %560 = shalt.err (!%p557_p2)
}
  0x24   : > { %s561_s5 = scalar_lea.vmem %s791_s12, 32  ;;  %s692_s7 = smov [#allocation2]  }
  0x25   : > { %p562_p3 = scmp.ne.s32.totalorder %s791_s12, %s561_s5  ;;  %s566_s8 = sshll.u32 %s692_s7, 4  ;;  %s567_s8 = int_to_ptr.vmem [resolvable:$false] %s566_s8 }
  0x26   : > { %s568_s9 = scalar_lea.vmem %s567_s8, 64  ;;  %p569_p9 = scmp.lt.s32.totalorder %s791_s12, %s567_s8 }
  0x27   : > { %p564_p6 = pnand %p562_p3, %p548_p5  ;;  %p570_p4 = scmp.lt.s32.totalorder %s568_s9, %s561_s5 }
  0x29   : > { %p565_p11 = pneg %p564_p6  ;;  %p571_p10 = por %p570_p4, %p569_p9 }
  0x2b   : > { %p572_p12 = pnand %p571_p10, %p565_p11 }
  0x2d   : > { %575 = shalt.err (!%p572_p12)
}
  0x2e   : > { %488 = dma.hbm_to_vmem [thread:$0]  (!%p795_p0), %s789_s10, 32, %s791_s12, %s205_s14  }
  0x2f   : > { %p947_p1 = scmp.lt.s32.totalorder %s690_s20, 3  ;;  %p948_p2 = scmp.ge.s32.totalorder %s690_s20, 1 }
  0x31   : > { %p222_p5 = pnand %p948_p2, %p947_p1 }
  0x32   : > { %s831_s11 = sand.u32 (!%p222_p5), 1, %s674_s16  }
  0x33   : > { %225 = sbr.rel (%p222_p5) target bundleno = 109 (0x6d), region = 32  ;;  %s834_s21 = sshll.u32 (!%p222_p5), %s831_s11, 1 }
  0x34   : > { %s228_s22 = scalar_lea.sflag (!%p222_p5), [#allocation3], %s831_s11  ;;  %s231_s13 = scalar_lea.vmem (!%p222_p5), [#allocation2], %s834_s21 }
  0x3a   : > { %657 = dma.done.wait (%p767_p8), %s228_s22, 32  }
  0x3b   : > { %659 = vsyncadd (%p767_p8), %s228_s22, 4294967264  ;;  %s261_s10 = scalar_lea.vmem [#allocation5], %s834_s21  ;;  %s475_s14 = sshll.u32 %s682_s18, 5  ;;  %v277_v0 = vld [vmem:[%s231_s13] sm:$0x3] }
  0x3c   : > { %s304_s12 = sshll.u32 %s261_s10, 4  ;;  %s268_s24 = scalar_lea.vmem [#allocation6], %s834_s21  ;;  %v278_v1 = vld [vmem:[%s937_s1] sm:$0x3]  ;;  %s850_s12 = int_to_ptr.vmem [resolvable:$true] %s304_s12 }
  0x3d   : > { %s318_s25 = sshll.u32 %s268_s24, 4  ;;  %v281_v2 = vld [vmem:[%s938_s2] sm:$0x3]  ;;  %v279_v3 = vmul.f32 %v278_v1, %v277_v0  ;;  %s858_s8 = scalar_lea.hbm %s939_s3, %s475_s14  ;;  %s860_s25 = int_to_ptr.vmem [resolvable:$true] %s318_s25 }
  0x3e   : > { %s865_s13 = scalar_lea.hbm %s940_s4, %s475_s14  ;;  %s285_s26 = scalar_lea.sflag [#allocation4], %s831_s11 }
  0x3f   : > { %280 = vst [vmem:[%s261_s10] sm:$0x3] %v279_v3  ;;  %v282_v4 = vmul.f32 %v281_v2, %v279_v3  ;;  %s576_s6 = scalar_lea.vmem %s850_s12, 32  ;;  %p949_p9 = scmp.ne.s32.totalorder %s944_s28, 0 }
  0x40   : > { %p577_p8 = scmp.ne.s32.totalorder %s850_s12, %s576_s6  ;;  %s693_s27 = smov [#allocation5]  }
  0x41   : > { %s580_s5 = sshll.u32 %s693_s27, 4  ;;  %s581_s5 = int_to_ptr.vmem [resolvable:$false] %s580_s5 }
  0x42   : > { %p578_p11 = pnand %p577_p8, %p949_p9  ;;  %s582_s18 = scalar_lea.vmem %s581_s5, 64 }
  0x43   : > { %p583_p7 = scmp.lt.s32.totalorder %s850_s12, %s581_s5  ;;  %p584_p13 = scmp.lt.s32.totalorder %s582_s18, %s576_s6 }
  0x44   : > { %p579_p0 = pneg %p578_p11 }
  0x45   : > { %p585_p3 = por %p584_p13, %p583_p7 }
  0x47   : > { %p586_p6 = pnand %p585_p3, %p579_p0 }
  0x49   : > { %589 = shalt.err (!%p586_p6)
}
  0x4a   : > { %s590_s10 = scalar_lea.hbm %s858_s8, 32  ;;  %s594_s9 = scalar_lea.hbm %s939_s3, 64 }
  0x4b   : > { %p591_p4 = scmp.ne.s32.totalorder %s858_s8, %s590_s10  ;;  %p595_p1 = scmp.lt.u32.totalorder %s858_s8, %s939_s3 }
  0x4c   : > { %p596_p2 = scmp.lt.u32.totalorder %s594_s9, %s590_s10  ;;  %p598_p8 = scmp.lt.u32.totalorder %s590_s10, %s858_s8 }
  0x4d   : > { %p592_p10 = pnand %p591_p4, %p949_p9 }
  0x4e   : > { %p597_p5 = por %p596_p2, %p595_p1 }
  0x4f   : > { %p593_p12 = pneg %p592_p10 }
  0x50   : > { %p599_p11 = por %p598_p8, %p597_p5 }
  0x52   : > { %p600_p0 = pnand %p599_p11, %p593_p12 }
  0x54   : > { %603 = shalt.err (!%p600_p0)
}
  0x55   : > { %481 = dma.vmem_to_hbm [thread:$0]  (%p949_p9), %s850_s12, 32, %s858_s8, %s285_s26   ;;  %283 = vst [vmem:[%s268_s24] sm:$0x3] %v282_v4 }
  0x56   : > { %s290_s6 = scalar_lea.sflag [#allocation7], %s831_s11  ;;  %s604_s5 = scalar_lea.vmem %s860_s25, 32 }
  0x57   : > { %p605_p7 = scmp.ne.s32.totalorder %s860_s25, %s604_s5  ;;  %s694_s18 = smov [#allocation6]  }
  0x58   : > { %s608_s10 = sshll.u32 %s694_s18, 4  ;;  %s609_s10 = int_to_ptr.vmem [resolvable:$false] %s608_s10 }
  0x59   : > { %p606_p13 = pnand %p605_p7, %p949_p9  ;;  %s610_s14 = scalar_lea.vmem %s609_s10, 64 }
  0x5a   : > { %p611_p6 = scmp.lt.s32.totalorder %s860_s25, %s609_s10  ;;  %p612_p4 = scmp.lt.s32.totalorder %s610_s14, %s604_s5 }
  0x5b   : > { %p607_p3 = pneg %p606_p13 }
  0x5c   : > { %p613_p10 = por %p612_p4, %p611_p6 }
  0x5e   : > { %p614_p12 = pnand %p613_p10, %p607_p3 }
  0x60   : > { %617 = shalt.err (!%p614_p12)
}
  0x61   : > { %s618_s11 = scalar_lea.hbm %s865_s13, 32  ;;  %s622_s24 = scalar_lea.hbm %s940_s4, 64 }
  0x62   : > { %p619_p1 = scmp.ne.s32.totalorder %s865_s13, %s618_s11  ;;  %p623_p8 = scmp.lt.u32.totalorder %s865_s13, %s940_s4 }
  0x63   : > { %p624_p11 = scmp.lt.u32.totalorder %s622_s24, %s618_s11  ;;  %p626_p7 = scmp.lt.u32.totalorder %s618_s11, %s865_s13 }
  0x64   : > { %p620_p2 = pnand %p619_p1, %p949_p9 }
  0x65   : > { %p625_p0 = por %p624_p11, %p623_p8 }
  0x66   : > { %p621_p5 = pneg %p620_p2 }
  0x67   : > { %p627_p13 = por %p626_p7, %p625_p0 }
  0x69   : > { %p628_p3 = pnand %p627_p13, %p621_p5 }
  0x6b   : > { %631 = shalt.err (!%p628_p3)
}
  0x6c   : > { %482 = dma.vmem_to_hbm [thread:$0]  (%p949_p9), %s860_s25, 32, %s865_s13, %s290_s6  }
  0x6d PF: > { %s330_s7 = sand.u32 1, %s670_s15   ;;  %p950_p6 = scmp.ne.s32.totalorder %s945_s30, 0 }
  0x6e   : > { %p951_p4 = scmp.ge.s32.totalorder %s690_s20, 2  ;;  %s331_s9 = scalar_lea.sflag [#allocation4], %s330_s7 }
  0x70   : > { %p490_p10 = pnand %p951_p4, %p950_p6 }
  0x72   : > { %661 = dma.done.wait (!%p490_p10), %s331_s9, 32  }
  0x73   : > { %663 = vsyncadd (!%p490_p10), %s331_s9, 4294967264  ;;  %s340_s22 = scalar_lea.sflag [#allocation7], %s330_s7 }
  0x74   : > { %665 = dma.done.wait (!%p490_p10), %s340_s22, 32  }
  0x75   : > { %667 = vsyncadd (!%p490_p10), %s340_s22, 4294967264  ;;  %s24_s20 = sadd.s32 1, %s690_s20   ;;  %s952_s15 = smov %s674_s16 }
  0x76   : > { %p21_p12 = scmp.ge.s32.totalorder %s24_s20, 4   ;;  %s953_s16 = smov %s678_s17 }
  0x77   : > { %s954_s17 = smov %s776_s29  ;;  %s955_s18 = smov %s686_s19 }
  0x78   : > { %s956_s19 = smov %s958_s23  ;;  %23 = sbr.rel (!%p21_p12) target bundleno = 8 (0x8), region = 100 }
  0x7f   :  { %345 = vsyncpa [#allocation3], 1 }
  0x80   :  { %347 = vsyncpa [#allocation3 + $0x1], 1 }
  0x81   :  { %348 = vsyncpa [#allocation4], 1 }
  0x82   :  { %350 = vsyncpa [#allocation4 + $0x1], 1 }
  0x83   :  { %351 = vsyncpa [#allocation7], 1 }
  0x84   :  { %353 = vsyncpa [#allocation7 + $0x1], 1 }

</bundles_post_ra>
